<compile_context>
chip_gen: v5e
topology: v5e:2x2
jax: 0.10.0
libtpu: 0.0.40
codegen_flags: <defaults>
</compile_context>

<pallas_src>
import math
import functools

import jax
import jax.numpy as jnp
from jax import lax
from jax.experimental import pallas as pl
from jax.experimental.pallas import tpu as pltpu


def _encoder_kernel(x_ref, wqkv_ref, bqkv_ref, wo_ref, bo_ref,
                    w1_ref, b1_ref, w2_ref, b2_ref, o_ref, att_ref,
                    *, BB, S, H, d_k, d_v, mm_dtype):
    R = BB * S                       # rows (= sequences x positions) in this block
    Hdk = H * d_k

    x = x_ref[...]                   # (R, D) f32
    xm = x.astype(mm_dtype)

    # ---- fused QKV projection: one 2-D MXU matmul, scale already folded into Q ----
    qkv = jnp.dot(xm, wqkv_ref[...], preferred_element_type=jnp.float32)
    qkv = qkv + bqkv_ref[...]                                  # (R, 2*H*dk + H*dv) f32
    qkv3 = qkv.reshape(BB, S, 2 * Hdk + H * d_v)               # leading-dim split only

    # ---- per-sequence attention (batch dim = BB), one head at a time ----
    # Each head is a (BB, S, dk)x(BB, S, dk) batched matmul -> (BB, S, S):
    # total MXU work is H*BB*S^2 (no cross-sequence waste, no mask needed).
    for h in range(H):
        q_h = qkv3[:, :, h * d_k:(h + 1) * d_k]                        # (BB, S, dk)
        k_h = qkv3[:, :, Hdk + h * d_k:Hdk + (h + 1) * d_k]            # (BB, S, dk)
        v_h = qkv3[:, :, 2 * Hdk + h * d_v:2 * Hdk + (h + 1) * d_v]    # (BB, S, dv)

        s = jnp.einsum('bqd,bkd->bqk', q_h.astype(mm_dtype), k_h.astype(mm_dtype),
                       preferred_element_type=jnp.float32)             # (BB, S, S) f32
        s = s - jnp.max(s, axis=-1, keepdims=True)                     # stable softmax (f32)
        p = jnp.exp(s)
        p = p * pl.reciprocal(jnp.sum(p, axis=-1, keepdims=True), approx=True)

        a_h = jnp.einsum('bqk,bkd->bqd', p.astype(mm_dtype), v_h.astype(mm_dtype),
                         preferred_element_type=jnp.float32)           # (BB, S, dv) f32
        att_ref[:, h * d_v:(h + 1) * d_v] = a_h.reshape(R, d_v)

    # ---- output projection: single matmul contracting over all heads (K = H*dv) ----
    proj = jnp.dot(att_ref[...].astype(mm_dtype), wo_ref[...],
                   preferred_element_type=jnp.float32) + bo_ref[...]   # (R, D)
    x1 = x + proj                                                      # residual

    # ---- F.normalize over dim=1 (sequence axis), eps=1e-12, all in f32 ----
    x1_3 = x1.reshape(BB, S, -1)
    ss = jnp.sum(x1_3 * x1_3, axis=1, keepdims=True)                   # (BB, 1, D)
    inv = lax.rsqrt(jnp.maximum(ss, 1e-24))                            # == 1/max(||.||, 1e-12)
    x2 = (x1_3 * inv).reshape(R, -1)

    # ---- FFN: Linear -> ReLU -> Linear, plus residual ----
    x2m = x2.astype(mm_dtype)
    h1 = jnp.maximum(
        jnp.dot(x2m, w1_ref[...], preferred_element_type=jnp.float32) + b1_ref[...], 0.0)
    ff = jnp.dot(h1.astype(mm_dtype), w2_ref[...],
                 preferred_element_type=jnp.float32) + b2_ref[...]
    o_ref[...] = (x2 + ff).astype(o_ref.dtype)


def encoder_forward(x, params, *, num_heads, d_k, d_v, batch_blocks=1,
                    matmul_dtype=jnp.bfloat16,
                    vmem_limit_bytes=64 * 1024 * 1024):
    """x: (B, S, D).  batch_blocks=1 -> whole batch in one grid step (best on
    single-TC v5e/v6e); use >=2 on v7x so both TensorCores get work (and lower
    vmem_limit_bytes to fit its 64 MiB VMEM).  matmul_dtype=bf16 feeds the MXU
    natively on all generations; elementwise math stays f32."""
    B, S, D = x.shape
    H = num_heads
    assert B % batch_blocks == 0, "batch_blocks must divide the batch size"
    BB = B // batch_blocks
    assert (BB * S) % 8 == 0, "per-block rows (BB*S) must be a multiple of 8 (sublanes)"
    (wq, bq, wk, bk, wv, bv, wo, bo, w1, b1, w2, b2) = params

    # ---- host-side weight plumbing (free, trace time) ----
    scale = 1.0 / math.sqrt(d_k)
    # fused [Q | K | V] projection weights, 1/sqrt(d_k) folded into Q
    # NOTE: with production dims (d_k = d_v = 128) the per-head lane slices in the
    # kernel land on 128-lane boundaries; tiny demo dims are unavoidably unaligned.
    wqkv = jnp.concatenate([wq * scale, wk, wv], axis=1).astype(matmul_dtype)  # (D, 2Hdk+Hdv)
    bqkv = jnp.concatenate([bq * scale, bk, bv], axis=1).astype(jnp.float32)   # (1, 2Hdk+Hdv)
    wo_m = wo.astype(matmul_dtype)                                             # (H*dv, D)
    w1_m = w1.astype(matmul_dtype)
    w2_m = w2.astype(matmul_dtype)
    bo_f = bo.astype(jnp.float32)
    b1_f = b1.astype(jnp.float32)
    b2_f = b2.astype(jnp.float32)

    x2d = x.reshape(B * S, D)

    kernel = functools.partial(_encoder_kernel, BB=BB, S=S, H=H,
                               d_k=d_k, d_v=d_v, mm_dtype=matmul_dtype)

    def _full(a):   # grid-invariant full-array block (constant index_map)
        return pl.BlockSpec(a.shape, lambda i, n=a.ndim: (0,) * n)

    grid_spec = pltpu.PrefetchScalarGridSpec(
        num_scalar_prefetch=0,
        grid=(batch_blocks,),
        in_specs=[pl.BlockSpec((BB * S, D), lambda i: (i, 0)),
                  _full(wqkv), _full(bqkv), _full(wo_m), _full(bo_f),
                  _full(w1_m), _full(b1_f), _full(w2_m), _full(b2_f)],
        out_specs=pl.BlockSpec((BB * S, D), lambda i: (i, 0)),
        scratch_shapes=[pltpu.VMEM((BB * S, H * d_v), jnp.float32)],
    )

    out2d = pl.pallas_call(
        kernel,
        out_shape=jax.ShapeDtypeStruct((B * S, D), x.dtype),
        grid_spec=grid_spec,
        compiler_params=pltpu.CompilerParams(
            dimension_semantics=("parallel",),
            vmem_limit_bytes=vmem_limit_bytes),
    )(x2d, wqkv, bqkv, wo_m, bo_f, w1_m, b1_f, w2_m, b2_f)
    return out2d.reshape(B, S, D)


def _reference(x, params, *, num_heads, d_k, d_v):
    # Pure-JAX (f32) reference mirroring the PyTorch forward pass.
    (wq, bq, wk, bk, wv, bv, wo, bo, w1, b1, w2, b2) = params
    B, S, D = x.shape
    q = x @ wq + bq
    k = x @ wk + bk
    v = x @ wv + bv
    q = q.reshape(B, S, num_heads, d_k).transpose(0, 2, 1, 3)
    k = k.reshape(B, S, num_heads, d_k).transpose(0, 2, 1, 3)
    v = v.reshape(B, S, num_heads, d_v).transpose(0, 2, 1, 3)
    s = jnp.einsum("bhqd,bhkd->bhqk", q, k) / math.sqrt(d_k)
    p = jax.nn.softmax(s, axis=-1)
    att = jnp.einsum("bhqk,bhkd->bhqd", p, v).transpose(0, 2, 1, 3).reshape(B, S, num_heads * d_v)
    x1 = x + (att @ wo + bo)
    norm = jnp.sqrt(jnp.sum(x1 * x1, axis=1, keepdims=True))   # F.normalize dim=1
    x2 = x1 / jnp.maximum(norm, 1e-12)
    ff = jnp.maximum(x2 @ w1 + b1, 0.0) @ w2 + b2
    return x2 + ff


if __name__ == "__main__":
    B, S = 2, 8
    H, D_MODEL, D_K, D_V = 4, 32, 8, 8

    key = jax.random.PRNGKey(0)
    keys = jax.random.split(key, 13)

    def lin(kw, fan_in, fan_out):
        return jax.random.normal(kw, (fan_in, fan_out), jnp.float32) * (1.0 / math.sqrt(fan_in))

    x = jax.random.normal(keys[0], (B, S, D_MODEL), jnp.float32)

    wq = lin(keys[1], D_MODEL, H * D_K); bq = jax.random.normal(keys[2], (1, H * D_K), jnp.float32) * 0.01
    wk = lin(keys[3], D_MODEL, H * D_K); bk = jax.random.normal(keys[4], (1, H * D_K), jnp.float32) * 0.01
    wv = lin(keys[5], D_MODEL, H * D_V); bv = jax.random.normal(keys[6], (1, H * D_V), jnp.float32) * 0.01
    wo = lin(keys[7], H * D_V, D_MODEL); bo = jax.random.normal(keys[8], (1, D_MODEL), jnp.float32) * 0.01
    w1 = lin(keys[9], D_MODEL, D_MODEL); b1 = jax.random.normal(keys[10], (1, D_MODEL), jnp.float32) * 0.01
    w2 = lin(keys[11], D_MODEL, D_MODEL); b2 = jax.random.normal(keys[12], (1, D_MODEL), jnp.float32) * 0.01

    params = (wq, bq, wk, bk, wv, bv, wo, bo, w1, b1, w2, b2)
    ref = _reference(x, params, num_heads=H, d_k=D_K, d_v=D_V)

    # bf16 MXU inputs (default), whole batch in one grid step (v5e/v6e style)
    out_bf16 = encoder_forward(x, params, num_heads=H, d_k=D_K, d_v=D_V,
                               batch_blocks=1, matmul_dtype=jnp.bfloat16)
    out_bf16 = jax.block_until_ready(out_bf16)
    assert out_bf16.shape == (B, S, D_MODEL)
    # bf16 matmul inputs -> ~0.5-1% relative error vs. the f32 reference
    assert jnp.allclose(out_bf16, ref, atol=3e-2, rtol=3e-2), "bf16 kernel mismatch vs reference"

    # f32 matmul inputs, batch split over 2 grid steps (v7x-style megacore split)
    out_f32 = encoder_forward(x, params, num_heads=H, d_k=D_K, d_v=D_V,
                              batch_blocks=2, matmul_dtype=jnp.float32)
    out_f32 = jax.block_until_ready(out_f32)
    # only remaining approximation is pl.reciprocal(approx=True) in the softmax
    assert jnp.allclose(out_f32, ref, atol=2e-3, rtol=2e-3), "f32 kernel mismatch vs reference"

    print("KERNEL_OK")
</pallas_src>

<mosaic_0001>
module attributes {stable_mosaic.version = 11 : i64} {
  func.func @_encoder_kernel(%arg0: i32, %arg1: memref<16x32xf32, #tpu.memory_space<vmem>>, %arg2: memref<32x96xbf16, #tpu.memory_space<vmem>>, %arg3: memref<1x96xf32, #tpu.memory_space<vmem>>, %arg4: memref<32x32xbf16, #tpu.memory_space<vmem>>, %arg5: memref<1x32xf32, #tpu.memory_space<vmem>>, %arg6: memref<32x32xbf16, #tpu.memory_space<vmem>>, %arg7: memref<1x32xf32, #tpu.memory_space<vmem>>, %arg8: memref<32x32xbf16, #tpu.memory_space<vmem>>, %arg9: memref<1x32xf32, #tpu.memory_space<vmem>>, %arg10: memref<16x32xf32, #tpu.memory_space<vmem>>, %arg11: memref<16x32xf32, #tpu.memory_space<vmem>>) attributes {dimension_semantics = [#tpu.dimension_semantics<parallel>], iteration_bounds = array<i64: 1>, scalar_prefetch = 0 : i64, scratch_operands = 1 : i64, tpu.core_type = #tpu.core_type<tc>, window_params = [{transform_indices = @transform_0, window_bounds = array<i64: 16, 32>}, {pipeline_mode = #tpu.pipeline_mode<synchronous>, transform_indices = @transform_1, window_bounds = array<i64: 32, 96>}, {pipeline_mode = #tpu.pipeline_mode<synchronous>, transform_indices = @transform_2, window_bounds = array<i64: 1, 96>}, {pipeline_mode = #tpu.pipeline_mode<synchronous>, transform_indices = @transform_3, window_bounds = array<i64: 32, 32>}, {pipeline_mode = #tpu.pipeline_mode<synchronous>, transform_indices = @transform_4, window_bounds = array<i64: 1, 32>}, {pipeline_mode = #tpu.pipeline_mode<synchronous>, transform_indices = @transform_5, window_bounds = array<i64: 32, 32>}, {pipeline_mode = #tpu.pipeline_mode<synchronous>, transform_indices = @transform_6, window_bounds = array<i64: 1, 32>}, {pipeline_mode = #tpu.pipeline_mode<synchronous>, transform_indices = @transform_7, window_bounds = array<i64: 32, 32>}, {pipeline_mode = #tpu.pipeline_mode<synchronous>, transform_indices = @transform_8, window_bounds = array<i64: 1, 32>}, {transform_indices = @transform_9, window_bounds = array<i64: 16, 32>}]} {
    %c0 = arith.constant 0 : index
    %c0_0 = arith.constant 0 : index
    %0 = vector.load %arg1[%c0, %c0_0] : memref<16x32xf32, #tpu.memory_space<vmem>>, vector<16x32xf32>
    %1 = arith.truncf %0 : vector<16x32xf32> to vector<16x32xbf16>
    %c0_1 = arith.constant 0 : index
    %c0_2 = arith.constant 0 : index
    %2 = vector.load %arg2[%c0_1, %c0_2] : memref<32x96xbf16, #tpu.memory_space<vmem>>, vector<32x96xbf16>
    %cst = arith.constant dense<0.000000e+00> : vector<16x96xf32>
    %3 = tpu.matmul %1, %2, %cst {dimension_numbers = #tpu.dot_dimension_numbers<[1], [0], [0], [1], [0, 0, 1, 1], [], []>} : vector<16x32xbf16>, vector<32x96xbf16>, vector<16x96xf32> -> vector<16x96xf32>
    %c0_3 = arith.constant 0 : index
    %c0_4 = arith.constant 0 : index
    %4 = vector.load %arg3[%c0_3, %c0_4] : memref<1x96xf32, #tpu.memory_space<vmem>>, vector<1x96xf32>
    %5 = vector.broadcast %4 : vector<1x96xf32> to vector<16x96xf32>
    %6 = arith.addf %3, %5 : vector<16x96xf32>
    %7 = vector.shape_cast %6 : vector<16x96xf32> to vector<2x8x96xf32>
    %8 = vector.extract_strided_slice %7 {offsets = [0, 0, 0], sizes = [2, 8, 8], strides = [1, 1, 1]} : vector<2x8x96xf32> to vector<2x8x8xf32>
    %9 = vector.extract_strided_slice %7 {offsets = [0, 0, 32], sizes = [2, 8, 8], strides = [1, 1, 1]} : vector<2x8x96xf32> to vector<2x8x8xf32>
    %10 = vector.extract_strided_slice %7 {offsets = [0, 0, 64], sizes = [2, 8, 8], strides = [1, 1, 1]} : vector<2x8x96xf32> to vector<2x8x8xf32>
    %11 = arith.truncf %8 : vector<2x8x8xf32> to vector<2x8x8xbf16>
    %12 = arith.truncf %9 : vector<2x8x8xf32> to vector<2x8x8xbf16>
    "tpu.trace_start"() <{level = 10 : i32, message = "bqd,bkd->bqk"}> : () -> ()
    %cst_5 = arith.constant dense<0.000000e+00> : vector<2x8x8xf32>
    %13 = tpu.matmul %11, %12, %cst_5 {dimension_numbers = #tpu.dot_dimension_numbers<[2], [2], [1], [1], [0, 0, 0, 1, 1, 1], [0], [0]>} : vector<2x8x8xbf16>, vector<2x8x8xbf16>, vector<2x8x8xf32> -> vector<2x8x8xf32>
    "tpu.trace_stop"() : () -> ()
    %cst_6 = arith.constant dense<0xFF800000> : vector<2x8xf32>
    %14 = vector.multi_reduction <maximumf>, %13, %cst_6 [2] : vector<2x8x8xf32> to vector<2x8xf32>
    %15 = vector.shape_cast %14 : vector<2x8xf32> to vector<2x8x1xf32>
    %16 = vector.broadcast %15 : vector<2x8x1xf32> to vector<2x8x8xf32>
    %17 = arith.subf %13, %16 : vector<2x8x8xf32>
    %18 = math.exp %17 : vector<2x8x8xf32>
    %cst_7 = arith.constant dense<0.000000e+00> : vector<2x8xf32>
    %19 = vector.multi_reduction <add>, %18, %cst_7 [2] : vector<2x8x8xf32> to vector<2x8xf32>
    %20 = vector.shape_cast %19 : vector<2x8xf32> to vector<2x8x1xf32>
    %21 = tpu.reciprocal %20 {approx = true} : vector<2x8x1xf32> -> vector<2x8x1xf32>
    %22 = vector.broadcast %21 : vector<2x8x1xf32> to vector<2x8x8xf32>
    %23 = arith.mulf %18, %22 : vector<2x8x8xf32>
    %24 = arith.truncf %23 : vector<2x8x8xf32> to vector<2x8x8xbf16>
    %25 = arith.truncf %10 : vector<2x8x8xf32> to vector<2x8x8xbf16>
    "tpu.trace_start"() <{level = 10 : i32, message = "bqk,bkd->bqd"}> : () -> ()
    %cst_8 = arith.constant dense<0.000000e+00> : vector<2x8x8xf32>
    %26 = tpu.matmul %24, %25, %cst_8 {dimension_numbers = #tpu.dot_dimension_numbers<[2], [1], [1], [2], [0, 0, 0, 1, 1, 2], [0], [0]>} : vector<2x8x8xbf16>, vector<2x8x8xbf16>, vector<2x8x8xf32> -> vector<2x8x8xf32>
    "tpu.trace_stop"() : () -> ()
    %27 = vector.shape_cast %26 : vector<2x8x8xf32> to vector<16x8xf32>
    %c0_9 = arith.constant 0 : index
    %c0_10 = arith.constant 0 : index
    %28 = vector.load %arg11[%c0_9, %c0_10] : memref<16x32xf32, #tpu.memory_space<vmem>>, vector<16x8xf32>
    tpu.vector_store %arg11[%c0_9, %c0_10], %27 {strides = array<i32>} : memref<16x32xf32, #tpu.memory_space<vmem>>, vector<16x8xf32>,
    %29 = vector.extract_strided_slice %7 {offsets = [0, 0, 8], sizes = [2, 8, 8], strides = [1, 1, 1]} : vector<2x8x96xf32> to vector<2x8x8xf32>
    %30 = vector.extract_strided_slice %7 {offsets = [0, 0, 40], sizes = [2, 8, 8], strides = [1, 1, 1]} : vector<2x8x96xf32> to vector<2x8x8xf32>
    %31 = vector.extract_strided_slice %7 {offsets = [0, 0, 72], sizes = [2, 8, 8], strides = [1, 1, 1]} : vector<2x8x96xf32> to vector<2x8x8xf32>
    %32 = arith.truncf %29 : vector<2x8x8xf32> to vector<2x8x8xbf16>
    %33 = arith.truncf %30 : vector<2x8x8xf32> to vector<2x8x8xbf16>
    "tpu.trace_start"() <{level = 10 : i32, message = "bqd,bkd->bqk"}> : () -> ()
    %cst_11 = arith.constant dense<0.000000e+00> : vector<2x8x8xf32>
    %34 = tpu.matmul %32, %33, %cst_11 {dimension_numbers = #tpu.dot_dimension_numbers<[2], [2], [1], [1], [0, 0, 0, 1, 1, 1], [0], [0]>} : vector<2x8x8xbf16>, vector<2x8x8xbf16>, vector<2x8x8xf32> -> vector<2x8x8xf32>
    "tpu.trace_stop"() : () -> ()
    %cst_12 = arith.constant dense<0xFF800000> : vector<2x8xf32>
    %35 = vector.multi_reduction <maximumf>, %34, %cst_12 [2] : vector<2x8x8xf32> to vector<2x8xf32>
    %36 = vector.shape_cast %35 : vector<2x8xf32> to vector<2x8x1xf32>
    %37 = vector.broadcast %36 : vector<2x8x1xf32> to vector<2x8x8xf32>
    %38 = arith.subf %34, %37 : vector<2x8x8xf32>
    %39 = math.exp %38 : vector<2x8x8xf32>
    %cst_13 = arith.constant dense<0.000000e+00> : vector<2x8xf32>
    %40 = vector.multi_reduction <add>, %39, %cst_13 [2] : vector<2x8x8xf32> to vector<2x8xf32>
    %41 = vector.shape_cast %40 : vector<2x8xf32> to vector<2x8x1xf32>
    %42 = tpu.reciprocal %41 {approx = true} : vector<2x8x1xf32> -> vector<2x8x1xf32>
    %43 = vector.broadcast %42 : vector<2x8x1xf32> to vector<2x8x8xf32>
    %44 = arith.mulf %39, %43 : vector<2x8x8xf32>
    %45 = arith.truncf %44 : vector<2x8x8xf32> to vector<2x8x8xbf16>
    %46 = arith.truncf %31 : vector<2x8x8xf32> to vector<2x8x8xbf16>
    "tpu.trace_start"() <{level = 10 : i32, message = "bqk,bkd->bqd"}> : () -> ()
    %cst_14 = arith.constant dense<0.000000e+00> : vector<2x8x8xf32>
    %47 = tpu.matmul %45, %46, %cst_14 {dimension_numbers = #tpu.dot_dimension_numbers<[2], [1], [1], [2], [0, 0, 0, 1, 1, 2], [0], [0]>} : vector<2x8x8xbf16>, vector<2x8x8xbf16>, vector<2x8x8xf32> -> vector<2x8x8xf32>
    "tpu.trace_stop"() : () -> ()
    %48 = vector.shape_cast %47 : vector<2x8x8xf32> to vector<16x8xf32>
    %c0_15 = arith.constant 0 : index
    %c8 = arith.constant 8 : index
    %49 = vector.load %arg11[%c0_15, %c8] : memref<16x32xf32, #tpu.memory_space<vmem>>, vector<16x8xf32>
    tpu.vector_store %arg11[%c0_15, %c8], %48 {strides = array<i32>} : memref<16x32xf32, #tpu.memory_space<vmem>>, vector<16x8xf32>,
    %50 = vector.extract_strided_slice %7 {offsets = [0, 0, 16], sizes = [2, 8, 8], strides = [1, 1, 1]} : vector<2x8x96xf32> to vector<2x8x8xf32>
    %51 = vector.extract_strided_slice %7 {offsets = [0, 0, 48], sizes = [2, 8, 8], strides = [1, 1, 1]} : vector<2x8x96xf32> to vector<2x8x8xf32>
    %52 = vector.extract_strided_slice %7 {offsets = [0, 0, 80], sizes = [2, 8, 8], strides = [1, 1, 1]} : vector<2x8x96xf32> to vector<2x8x8xf32>
    %53 = arith.truncf %50 : vector<2x8x8xf32> to vector<2x8x8xbf16>
    %54 = arith.truncf %51 : vector<2x8x8xf32> to vector<2x8x8xbf16>
    "tpu.trace_start"() <{level = 10 : i32, message = "bqd,bkd->bqk"}> : () -> ()
    %cst_16 = arith.constant dense<0.000000e+00> : vector<2x8x8xf32>
    %55 = tpu.matmul %53, %54, %cst_16 {dimension_numbers = #tpu.dot_dimension_numbers<[2], [2], [1], [1], [0, 0, 0, 1, 1, 1], [0], [0]>} : vector<2x8x8xbf16>, vector<2x8x8xbf16>, vector<2x8x8xf32> -> vector<2x8x8xf32>
    "tpu.trace_stop"() : () -> ()
    %cst_17 = arith.constant dense<0xFF800000> : vector<2x8xf32>
    %56 = vector.multi_reduction <maximumf>, %55, %cst_17 [2] : vector<2x8x8xf32> to vector<2x8xf32>
    %57 = vector.shape_cast %56 : vector<2x8xf32> to vector<2x8x1xf32>
    %58 = vector.broadcast %57 : vector<2x8x1xf32> to vector<2x8x8xf32>
    %59 = arith.subf %55, %58 : vector<2x8x8xf32>
    %60 = math.exp %59 : vector<2x8x8xf32>
    %cst_18 = arith.constant dense<0.000000e+00> : vector<2x8xf32>
    %61 = vector.multi_reduction <add>, %60, %cst_18 [2] : vector<2x8x8xf32> to vector<2x8xf32>
    %62 = vector.shape_cast %61 : vector<2x8xf32> to vector<2x8x1xf32>
    %63 = tpu.reciprocal %62 {approx = true} : vector<2x8x1xf32> -> vector<2x8x1xf32>
    %64 = vector.broadcast %63 : vector<2x8x1xf32> to vector<2x8x8xf32>
    %65 = arith.mulf %60, %64 : vector<2x8x8xf32>
    %66 = arith.truncf %65 : vector<2x8x8xf32> to vector<2x8x8xbf16>
    %67 = arith.truncf %52 : vector<2x8x8xf32> to vector<2x8x8xbf16>
    "tpu.trace_start"() <{level = 10 : i32, message = "bqk,bkd->bqd"}> : () -> ()
    %cst_19 = arith.constant dense<0.000000e+00> : vector<2x8x8xf32>
    %68 = tpu.matmul %66, %67, %cst_19 {dimension_numbers = #tpu.dot_dimension_numbers<[2], [1], [1], [2], [0, 0, 0, 1, 1, 2], [0], [0]>} : vector<2x8x8xbf16>, vector<2x8x8xbf16>, vector<2x8x8xf32> -> vector<2x8x8xf32>
    "tpu.trace_stop"() : () -> ()
    %69 = vector.shape_cast %68 : vector<2x8x8xf32> to vector<16x8xf32>
    %c0_20 = arith.constant 0 : index
    %c16 = arith.constant 16 : index
    %70 = vector.load %arg11[%c0_20, %c16] : memref<16x32xf32, #tpu.memory_space<vmem>>, vector<16x8xf32>
    tpu.vector_store %arg11[%c0_20, %c16], %69 {strides = array<i32>} : memref<16x32xf32, #tpu.memory_space<vmem>>, vector<16x8xf32>,
    %71 = vector.extract_strided_slice %7 {offsets = [0, 0, 24], sizes = [2, 8, 8], strides = [1, 1, 1]} : vector<2x8x96xf32> to vector<2x8x8xf32>
    %72 = vector.extract_strided_slice %7 {offsets = [0, 0, 56], sizes = [2, 8, 8], strides = [1, 1, 1]} : vector<2x8x96xf32> to vector<2x8x8xf32>
    %73 = vector.extract_strided_slice %7 {offsets = [0, 0, 88], sizes = [2, 8, 8], strides = [1, 1, 1]} : vector<2x8x96xf32> to vector<2x8x8xf32>
    %74 = arith.truncf %71 : vector<2x8x8xf32> to vector<2x8x8xbf16>
    %75 = arith.truncf %72 : vector<2x8x8xf32> to vector<2x8x8xbf16>
    "tpu.trace_start"() <{level = 10 : i32, message = "bqd,bkd->bqk"}> : () -> ()
    %cst_21 = arith.constant dense<0.000000e+00> : vector<2x8x8xf32>
    %76 = tpu.matmul %74, %75, %cst_21 {dimension_numbers = #tpu.dot_dimension_numbers<[2], [2], [1], [1], [0, 0, 0, 1, 1, 1], [0], [0]>} : vector<2x8x8xbf16>, vector<2x8x8xbf16>, vector<2x8x8xf32> -> vector<2x8x8xf32>
    "tpu.trace_stop"() : () -> ()
    %cst_22 = arith.constant dense<0xFF800000> : vector<2x8xf32>
    %77 = vector.multi_reduction <maximumf>, %76, %cst_22 [2] : vector<2x8x8xf32> to vector<2x8xf32>
    %78 = vector.shape_cast %77 : vector<2x8xf32> to vector<2x8x1xf32>
    %79 = vector.broadcast %78 : vector<2x8x1xf32> to vector<2x8x8xf32>
    %80 = arith.subf %76, %79 : vector<2x8x8xf32>
    %81 = math.exp %80 : vector<2x8x8xf32>
    %cst_23 = arith.constant dense<0.000000e+00> : vector<2x8xf32>
    %82 = vector.multi_reduction <add>, %81, %cst_23 [2] : vector<2x8x8xf32> to vector<2x8xf32>
    %83 = vector.shape_cast %82 : vector<2x8xf32> to vector<2x8x1xf32>
    %84 = tpu.reciprocal %83 {approx = true} : vector<2x8x1xf32> -> vector<2x8x1xf32>
    %85 = vector.broadcast %84 : vector<2x8x1xf32> to vector<2x8x8xf32>
    %86 = arith.mulf %81, %85 : vector<2x8x8xf32>
    %87 = arith.truncf %86 : vector<2x8x8xf32> to vector<2x8x8xbf16>
    %88 = arith.truncf %73 : vector<2x8x8xf32> to vector<2x8x8xbf16>
    "tpu.trace_start"() <{level = 10 : i32, message = "bqk,bkd->bqd"}> : () -> ()
    %cst_24 = arith.constant dense<0.000000e+00> : vector<2x8x8xf32>
    %89 = tpu.matmul %87, %88, %cst_24 {dimension_numbers = #tpu.dot_dimension_numbers<[2], [1], [1], [2], [0, 0, 0, 1, 1, 2], [0], [0]>} : vector<2x8x8xbf16>, vector<2x8x8xbf16>, vector<2x8x8xf32> -> vector<2x8x8xf32>
    "tpu.trace_stop"() : () -> ()
    %90 = vector.shape_cast %89 : vector<2x8x8xf32> to vector<16x8xf32>
    %c0_25 = arith.constant 0 : index
    %c24 = arith.constant 24 : index
    %91 = vector.load %arg11[%c0_25, %c24] : memref<16x32xf32, #tpu.memory_space<vmem>>, vector<16x8xf32>
    tpu.vector_store %arg11[%c0_25, %c24], %90 {strides = array<i32>} : memref<16x32xf32, #tpu.memory_space<vmem>>, vector<16x8xf32>,
    %c0_26 = arith.constant 0 : index
    %c0_27 = arith.constant 0 : index
    %92 = vector.load %arg11[%c0_26, %c0_27] : memref<16x32xf32, #tpu.memory_space<vmem>>, vector<16x32xf32>
    %93 = arith.truncf %92 : vector<16x32xf32> to vector<16x32xbf16>
    %c0_28 = arith.constant 0 : index
    %c0_29 = arith.constant 0 : index
    %94 = vector.load %arg4[%c0_28, %c0_29] : memref<32x32xbf16, #tpu.memory_space<vmem>>, vector<32x32xbf16>
    %cst_30 = arith.constant dense<0.000000e+00> : vector<16x32xf32>
    %95 = tpu.matmul %93, %94, %cst_30 {dimension_numbers = #tpu.dot_dimension_numbers<[1], [0], [0], [1], [0, 0, 1, 1], [], []>} : vector<16x32xbf16>, vector<32x32xbf16>, vector<16x32xf32> -> vector<16x32xf32>
    %c0_31 = arith.constant 0 : index
    %c0_32 = arith.constant 0 : index
    %96 = vector.load %arg5[%c0_31, %c0_32] : memref<1x32xf32, #tpu.memory_space<vmem>>, vector<1x32xf32>
    %97 = vector.broadcast %96 : vector<1x32xf32> to vector<16x32xf32>
    %98 = arith.addf %95, %97 : vector<16x32xf32>
    %99 = arith.addf %0, %98 : vector<16x32xf32>
    %100 = vector.shape_cast %99 : vector<16x32xf32> to vector<2x8x32xf32>
    %101 = arith.mulf %100, %100 : vector<2x8x32xf32>
    %cst_33 = arith.constant dense<0.000000e+00> : vector<2x32xf32>
    %102 = vector.multi_reduction <add>, %101, %cst_33 [1] : vector<2x8x32xf32> to vector<2x32xf32>
    %103 = vector.shape_cast %102 : vector<2x32xf32> to vector<2x1x32xf32>
    %cst_34 = arith.constant 1.000000e-24 : f32
    %104 = vector.broadcast %cst_34 : f32 to vector<2x1x32xf32>
    %105 = arith.maximumf %103, %104 : vector<2x1x32xf32>
    %106 = math.rsqrt %105 : vector<2x1x32xf32>
    %107 = vector.broadcast %106 : vector<2x1x32xf32> to vector<2x8x32xf32>
    %108 = arith.mulf %100, %107 : vector<2x8x32xf32>
    %109 = vector.shape_cast %108 : vector<2x8x32xf32> to vector<16x32xf32>
    %110 = arith.truncf %109 : vector<16x32xf32> to vector<16x32xbf16>
    %c0_35 = arith.constant 0 : index
    %c0_36 = arith.constant 0 : index
    %111 = vector.load %arg6[%c0_35, %c0_36] : memref<32x32xbf16, #tpu.memory_space<vmem>>, vector<32x32xbf16>
    %cst_37 = arith.constant dense<0.000000e+00> : vector<16x32xf32>
    %112 = tpu.matmul %110, %111, %cst_37 {dimension_numbers = #tpu.dot_dimension_numbers<[1], [0], [0], [1], [0, 0, 1, 1], [], []>} : vector<16x32xbf16>, vector<32x32xbf16>, vector<16x32xf32> -> vector<16x32xf32>
    %c0_38 = arith.constant 0 : index
    %c0_39 = arith.constant 0 : index
    %113 = vector.load %arg7[%c0_38, %c0_39] : memref<1x32xf32, #tpu.memory_space<vmem>>, vector<1x32xf32>
    %114 = vector.broadcast %113 : vector<1x32xf32> to vector<16x32xf32>
    %115 = arith.addf %112, %114 : vector<16x32xf32>
    %cst_40 = arith.constant 0.000000e+00 : f32
    %116 = vector.broadcast %cst_40 : f32 to vector<16x32xf32>
    %117 = arith.maximumf %115, %116 : vector<16x32xf32>
    %118 = arith.truncf %117 : vector<16x32xf32> to vector<16x32xbf16>
    %c0_41 = arith.constant 0 : index
    %c0_42 = arith.constant 0 : index
    %119 = vector.load %arg8[%c0_41, %c0_42] : memref<32x32xbf16, #tpu.memory_space<vmem>>, vector<32x32xbf16>
    %cst_43 = arith.constant dense<0.000000e+00> : vector<16x32xf32>
    %120 = tpu.matmul %118, %119, %cst_43 {dimension_numbers = #tpu.dot_dimension_numbers<[1], [0], [0], [1], [0, 0, 1, 1], [], []>} : vector<16x32xbf16>, vector<32x32xbf16>, vector<16x32xf32> -> vector<16x32xf32>
    %c0_44 = arith.constant 0 : index
    %c0_45 = arith.constant 0 : index
    %121 = vector.load %arg9[%c0_44, %c0_45] : memref<1x32xf32, #tpu.memory_space<vmem>>, vector<1x32xf32>
    %122 = vector.broadcast %121 : vector<1x32xf32> to vector<16x32xf32>
    %123 = arith.addf %120, %122 : vector<16x32xf32>
    %124 = arith.addf %109, %123 : vector<16x32xf32>
    %c0_46 = arith.constant 0 : index
    %c0_47 = arith.constant 0 : index
    %125 = vector.load %arg10[%c0_46, %c0_47] : memref<16x32xf32, #tpu.memory_space<vmem>>, vector<16x32xf32>
    tpu.vector_store %arg10[%c0_46, %c0_47], %124 {strides = array<i32>} : memref<16x32xf32, #tpu.memory_space<vmem>>, vector<16x32xf32>,
    return
  }
  func.func @transform_0(%arg0: i32) -> (i32, i32) {
    %c0_i32 = arith.constant 0 : i32
    %c0_i32_0 = arith.constant 0 : i32
    return %arg0, %c0_i32 : i32, i32
  }
  func.func @transform_1(%arg0: i32) -> (i32, i32) {
    %c0_i32 = arith.constant 0 : i32
    %c0_i32_0 = arith.constant 0 : i32
    %c0_i32_1 = arith.constant 0 : i32
    return %c0_i32, %c0_i32_0 : i32, i32
  }
  func.func @transform_2(%arg0: i32) -> (i32, i32) {
    %c0_i32 = arith.constant 0 : i32
    %c0_i32_0 = arith.constant 0 : i32
    %c0_i32_1 = arith.constant 0 : i32
    return %c0_i32, %c0_i32_0 : i32, i32
  }
  func.func @transform_3(%arg0: i32) -> (i32, i32) {
    %c0_i32 = arith.constant 0 : i32
    %c0_i32_0 = arith.constant 0 : i32
    %c0_i32_1 = arith.constant 0 : i32
    return %c0_i32, %c0_i32_0 : i32, i32
  }
  func.func @transform_4(%arg0: i32) -> (i32, i32) {
    %c0_i32 = arith.constant 0 : i32
    %c0_i32_0 = arith.constant 0 : i32
    %c0_i32_1 = arith.constant 0 : i32
    return %c0_i32, %c0_i32_0 : i32, i32
  }
  func.func @transform_5(%arg0: i32) -> (i32, i32) {
    %c0_i32 = arith.constant 0 : i32
    %c0_i32_0 = arith.constant 0 : i32
    %c0_i32_1 = arith.constant 0 : i32
    return %c0_i32, %c0_i32_0 : i32, i32
  }
  func.func @transform_6(%arg0: i32) -> (i32, i32) {
    %c0_i32 = arith.constant 0 : i32
    %c0_i32_0 = arith.constant 0 : i32
    %c0_i32_1 = arith.constant 0 : i32
    return %c0_i32, %c0_i32_0 : i32, i32
  }
  func.func @transform_7(%arg0: i32) -> (i32, i32) {
    %c0_i32 = arith.constant 0 : i32
    %c0_i32_0 = arith.constant 0 : i32
    %c0_i32_1 = arith.constant 0 : i32
    return %c0_i32, %c0_i32_0 : i32, i32
  }
  func.func @transform_8(%arg0: i32) -> (i32, i32) {
    %c0_i32 = arith.constant 0 : i32
    %c0_i32_0 = arith.constant 0 : i32
    %c0_i32_1 = arith.constant 0 : i32
    return %c0_i32, %c0_i32_0 : i32, i32
  }
  func.func @transform_9(%arg0: i32) -> (i32, i32) {
    %c0_i32 = arith.constant 0 : i32
    %c0_i32_0 = arith.constant 0 : i32
    return %arg0, %c0_i32 : i32, i32
  }
}

</mosaic_0001>

<bundles_post_ra>
// kernel: tpu_custom_call.1
= control target key start
LH: loop header
LB: loop body
LE: loop exit
PB: predicated region body
PF: predicated region fallthrough
CT: control target
= control target key end

     0   :  { %14 = vsyncpa [#allocation4], 0  ;;  %s1349_s0 = inlined_call_operand.hbm [shape: f32[16,32], index: 0, kind: input, shape index: {}]   ;;  %s1350_s1 = inlined_call_operand.hbm [shape: bf16[32,96], index: 1, kind: input, shape index: {}]   ;;  %s1351_s2 = inlined_call_operand.vmem [shape: f32[1,96], index: 2, kind: input, shape index: {}]   ;;  %s1352_s3 = inlined_call_operand.hbm [shape: bf16[32,32], index: 3, kind: input, shape index: {}]   ;;  %s1353_s4 = inlined_call_operand.vmem [shape: f32[1,32], index: 4, kind: input, shape index: {}]   ;;  %s1354_s5 = inlined_call_operand.hbm [shape: bf16[32,32], index: 5, kind: input, shape index: {}]   ;;  %s1355_s6 = inlined_call_operand.vmem [shape: f32[1,32], index: 6, kind: input, shape index: {}]   ;;  %s1356_s7 = inlined_call_operand.hbm [shape: bf16[32,32], index: 7, kind: input, shape index: {}]   ;;  %s1357_s8 = inlined_call_operand.vmem [shape: f32[1,32], index: 8, kind: input, shape index: {}]   ;;  %s1358_s9 = inlined_call_operand.hbm [shape: f32[16,32], index: 9, kind: output, shape index: {}]  }
   0x1   :  { %15 = vsyncpa [#allocation7], 0 }
   0x2   :  { %16 = vsyncpa [#allocation10], 0  ;;  %s35_s11 = sshll.u32 %s1350_s1, 4  ;;  %s36_s11 = int_to_ptr.hbm [resolvable:$true] %s35_s11 }
   0x3   :  { %17 = vsyncpa [#allocation5], 0  ;;  %s1101_s12 = smov [#allocation6]   ;;  %s65_s16 = sshll.u32 %s1354_s5, 4  ;;  %s66_s16 = int_to_ptr.hbm [resolvable:$true] %s65_s16 }
   0x4   :  { %s37_s13 = sshll.u32 %s1101_s12, 4  ;;  %s1102_s17 = smov 64   ;;  %s38_s13 = int_to_ptr.vmem [resolvable:$true] %s37_s13 }
   0x5   :  { %s1103_s18 = smov 4   ;;  %s1104_s19 = smov [#allocation9]  }
   0x6   :  { %43 = dma.hbm_to_vmem [thread:$0]  %s36_s11, 256, %s38_s13, [#allocation7], %s1102_s17, %s1102_s17, %s1103_s18  }
   0x7   :  { %s67_s20 = sshll.u32 %s1104_s19, 4  ;;  %s22_s22 = sshll.u32 %s1349_s0, 4  ;;  %s68_s20 = int_to_ptr.vmem [resolvable:$true] %s67_s20  ;;  %s23_s22 = int_to_ptr.hbm [resolvable:$true] %s22_s22 }
   0x8   :  { %73 = dma.hbm_to_vmem [thread:$0]  %s66_s16, 256, %s68_s20, [#allocation10], %s1102_s17, %s1102_s17, %s1103_s18  }
   0x9   :  { %s1105_s5 = smov [#allocation3]   ;;  %s50_s26 = sshll.u32 %s1352_s3, 4  ;;  %s51_s26 = int_to_ptr.hbm [resolvable:$true] %s50_s26 }
   0xa   :  { %s24_s23 = sshll.u32 %s1105_s5, 4  ;;  %s1106_s27 = smov 128   ;;  %s25_s23 = int_to_ptr.vmem [resolvable:$true] %s24_s23 }
   0xb   :  { %s1107_s28 = smov 8   ;;  %s1108_s0 = smov [#allocation8]  }
   0xc   :  { %30 = dma.hbm_to_vmem [thread:$0]  %s23_s22, 256, %s25_s23, [#allocation4], %s1106_s27, %s1106_s27, %s1107_s28  }
   0xd   :  { %s52_s29 = sshll.u32 %s1108_s0, 4  ;;  %s80_s11 = sshll.u32 %s1356_s7, 4  ;;  %s53_s29 = int_to_ptr.vmem [resolvable:$true] %s52_s29  ;;  %s81_s11 = int_to_ptr.hbm [resolvable:$true] %s80_s11 }
   0xe   :  { %58 = dma.hbm_to_vmem [thread:$0]  %s51_s26, 256, %s53_s29, [#allocation7], %s1102_s17, %s1102_s17, %s1103_s18  }
   0xf   :  { %s1109_s3 = smov [#allocation11]  }
  0x10   :  { %s82_s12 = sshll.u32 %s1109_s3, 4  ;;  %s83_s12 = int_to_ptr.vmem [resolvable:$true] %s82_s12 }
  0x11   :  { %88 = dma.hbm_to_vmem [thread:$0]  %s81_s11, 256, %s83_s12, [#allocation10], %s1102_s17, %s1102_s17, %s1103_s18  }
  0x12   :  { %1093 = dma.done.wait [#allocation4], 256  }
  0x13   :  { %1094 = vsyncadd [#allocation4], 4294967040 }
  0x14   :  { %1095 = dma.done.wait [#allocation7], 512  }
  0x15   :  { %1096 = vsyncadd [#allocation7], 4294966784 }
  0x16   :  { %1097 = dma.done.wait [#allocation10], 512  }
  0x17   :  { %1098 = vsyncadd [#allocation10], 4294966784  ;;  %v880_v0 = vld [vmem:[#allocation6 + $0x8] sm:$0xff]  ;;  %v879_v1 = vld [vmem:[#allocation6] sm:$0xff]  ;;  %vm135_vm0 = vcmask 261120   ;;  %s1110_s14 = smov 120  }
  0x18   :  { %v1203_v2 = vld [vmem:[#allocation3] sm:$0xff]  ;;  %v1205_v3 = vld [vmem:[#allocation3 + $0x8] sm:$0xff]  ;;  %145 = vmatpush.bf16.msra.mxu0 %v880_v0  ;;  %v909_v5 = vld [vmem:[%s1351_s2] ss:$0 sm:$0xff]  ;;  %s1111_s15 = smov 88   ;;  %s1112_s16 = smov 96  }
  0x19   :  { %v114_v4 = vpack.c.bf16 %v1205_v3, %v1203_v2  ;;  %s1113_s2 = smov 112   ;;  %s1114_s18 = smov 80   ;;  %vm160_vm1 = vcmask 64512   ;;  %vm233_vm2 = vcmask 1043456   ;;  %vm393_vm3 = vcmask 130112  }
  0x1a   :  { %s1115_s19 = smov 72   ;;  %s1116_s20 = smov 104   ;;  %vm516_vm4 = vcmask 195712   ;;  %vm639_vm5 = vcmask 261312  }
  0x1b   :  { %s1117_s21 = smov 56   ;;  %s1119_s1 = smov 40  }
  0x1c   :  { %146 = vmatpush.bf16.msra.mxu0 %v879_v1  ;;  %s1120_s22 = smov 16   ;;  %s1121_s5 = smov 24  }
  0x1d   :  { %s1122_s29 = smov [#allocation12]   ;;  %s812_s11 = sshll.u32 %s1358_s9, 4  ;;  %s813_s11 = int_to_ptr.hbm [resolvable:$true] %s812_s11 }
  0x1f   :  { %835 = vmatmul.msk.bf16.vlgmr.msra.gmra.mxu0 %vm135_vm0, %v114_v4 }
  0x9c   :  { %v148_v6 = vpop.f32.mrf.mxu0 }
  0x9d   :  { %v149_v7 = vadd.f32 %v909_v5, %v148_v6 }
  0x9f   :  { %v153_v8 = vpack.c.bf16 %v149_v7, %v149_v7 }
  0xa1   :  { %v156_v9 = vunpack.c.l.b16 %v153_v8 }
  0xa3   :  { %v1213_v10 = vpack.c.b16 %v156_v9, %v156_v9 }
  0xa4   :  { %v150_v11 = vpop.f32.mrf.mxu0 }
  0xa5   :  { %v151_v12 = vadd.f32 %v909_v5, %v150_v11  ;;  %273 = vrot.lane.b32.xlu2 %v1213_v10, %s1110_s14  ;;  %275 = vrot.lane.b32.xlu1 %v1213_v10, %s1111_s15 }
  0xa6   :  { %158 = vrot.lane.b32.xlu0 %v1213_v10, %s1112_s16 }
  0xa7   :  { %v154_v13 = vpack.c.bf16 %v151_v12, %v151_v12 }
  0xa9   :  { %v181_v14 = vunpack.c.l.b16 %v154_v13 }
  0xab   :  { %v1218_v15 = vpack.c.b16 %v181_v14, %v181_v14 }
  0xad   :  { %296 = vrot.lane.b32.xlu2 %v1218_v15, %s1110_s14  ;;  %298 = vrot.lane.b32.xlu1 %v1218_v15, %s1111_s15 }
  0xae   :  { %183 = vrot.lane.b32.xlu0 %v1218_v15, %s1112_s16 }
  0xb5   :  { %396 = vrot.lane.b32.xlu2 %v1213_v10, %s1113_s2  ;;  %421 = vrot.lane.b32.xlu1 %v1218_v15, %s1114_s18 }
  0xb6   :  { %398 = vrot.lane.b32.xlu0 %v1213_v10, %s1114_s18 }
  0xbd   :  { %544 = vrot.lane.b32.xlu2 %v1218_v15, %s1115_s19  ;;  %521 = vrot.lane.b32.xlu1 %v1213_v10, %s1115_s19 }
  0xbe   :  { %419 = vrot.lane.b32.xlu0 %v1218_v15, %s1113_s2 }
  0xc5   :  { %542 = vrot.lane.b32.xlu1 %v1218_v15, %s1116_s20 }
  0xc6   :  { %519 = vrot.lane.b32.xlu0 %v1213_v10, %s1116_s20 }
  0xff   :  { %v274_v16 = vpop.permute.xlu2 %273 }
 0x107   :  { %v297_v21 = vpop.permute.xlu2 %296 }
 0x10f   :  { %v397_v26 = vpop.permute.xlu2 %396 }
 0x117   :  { %v276_v17 = vpop.permute.xlu1 %275  ;;  %v545_v31 = vpop.permute.xlu2 %544 }
 0x118   :  { %v159_v18 = vpop.permute.xlu0 %158  ;;  %v281_v19 = vsel %vm160_vm1, %v276_v17, 0  ;;  %v550_v34 = vsel %vm160_vm1, %v545_v31, 0 }
 0x119   :  { %v165_v20 = vsel %vm160_vm1, %v159_v18, 0  ;;  %290 = vmatpush.bf16.xpose.msrb.mxu0 %v281_v19 }
 0x11a   :  { %174 = vmatpush.bf16.xpose.msra.mxu1 %v165_v20 }
 0x11f   :  { %v299_v22 = vpop.permute.xlu1 %298 }
 0x120   :  { %v184_v23 = vpop.permute.xlu0 %183  ;;  %840 = vmatmul.msk.bf16.vlgmr.msrb.gmra.mxu0 %vm160_vm1, %v274_v16  ;;  %v304_v24 = vsel %vm160_vm1, %v299_v22, 0 }
 0x121   :  { %836 = vmatmul.msk.bf16.vlgmr.msra.gmra.mxu1 %vm160_vm1, %v153_v8  ;;  %v189_v25 = vsel %vm160_vm1, %v184_v23, 0 }
 0x122   :  { %198 = vmatpush.bf16.xpose.msra.mxu2 %v189_v25  ;;  %313 = vmatpush.bf16.xpose.msrb.mxu1 %v304_v24 }
 0x127   :  { %v422_v27 = vpop.permute.xlu1 %421 }
 0x128   :  { %v427_v28 = vsel %vm160_vm1, %v422_v27, 0  ;;  %v399_v29 = vpop.permute.xlu0 %398 }
 0x129   :  { %v404_v30 = vsel %vm160_vm1, %v399_v29, 0  ;;  %837 = vmatmul.msk.bf16.vlgmr.msra.gmra.mxu2 %vm160_vm1, %v154_v13 }
 0x12a   :  { %436 = vmatpush.bf16.xpose.msra.mxu1 %v427_v28  ;;  %413 = vmatpush.bf16.xpose.msra.mxu0 %v404_v30 }
 0x12f   :  { %v522_v32 = vpop.permute.xlu1 %521 }
 0x130   :  { %v527_v33 = vsel %vm160_vm1, %v522_v32, 0  ;;  %v420_v35 = vpop.permute.xlu0 %419 }
 0x131   :  { %841 = vmatmul.msk.bf16.vlgmr.msrb.gmra.mxu1 %vm160_vm1, %v297_v21  ;;  %844 = vmatmul.msk.bf16.vlgmr.msra.gmra.mxu0 %vm160_vm1, %v397_v26 }
 0x132   :  { %559 = vmatpush.bf16.xpose.msrb.mxu1 %v550_v34  ;;  %536 = vmatpush.bf16.xpose.msrb.mxu0 %v527_v33 }
 0x137   :  { %v543_v37 = vpop.permute.xlu1 %542 }
 0x138   :  { %v520_v36 = vpop.permute.xlu0 %519 }
 0x141   :  { %845 = vmatmul.msk.bf16.vlgmr.msra.gmra.mxu1 %vm160_vm1, %v420_v35  ;;  %848 = vmatmul.msk.bf16.vlgmr.msrb.gmra.mxu0 %vm160_vm1, %v520_v36 }
 0x151   :  { %849 = vmatmul.msk.bf16.vlgmr.msrb.gmra.mxu1 %vm160_vm1, %v543_v37 }
 0x19d   :  { %v292_v38 = vpop.f32.mrf.mxu0 }
 0x19e   :  { %v176_v39 = vpop.f32.mrf.mxu1  ;;  %v319_v40 = vsel %vm160_vm1, %v292_v38, -inf }
 0x19f   :  { %320 = vmax.xlane.f32.xlu1 %v319_v40  ;;  %v204_v41 = vsel %vm160_vm1, %v176_v39, -inf }
 0x1a0   :  { %205 = vmax.xlane.f32.xlu2 %v204_v41 }
 0x1a5   :  { %v294_v42 = vpop.f32.mrf.mxu0 }
 0x1a6   :  { %v178_v43 = vpop.f32.mrf.mxu1 }
 0x1ac   :  { %v200_v44 = vpop.f32.mrf.mxu2 }
 0x1ad   :  { %v207_v45 = vsel %vm160_vm1, %v200_v44, -inf }
 0x1ae   :  { %v315_v46 = vpop.f32.mrf.mxu1  ;;  %208 = vmax.xlane.f32.xlu0 %v207_v45  ;;  %v1250_v47 = vpop.f32.mrf.mxu0 }
 0x1af   :  { %v322_v48 = vsel %vm160_vm1, %v315_v46, -inf  ;;  %v442_v60 = vsel %vm160_vm1, %v1250_v47, -inf }
 0x1b0   :  { %323 = vmax.xlane.f32.xlu2 %v322_v48 }
 0x1b4   :  { %v202_v49 = vpop.f32.mrf.mxu2 }
 0x1b6   :  { %v317_v50 = vpop.f32.mrf.mxu1  ;;  %v417_v51 = vpop.f32.mrf.mxu0 }
 0x1b8   :  { %250 = vrot.lane.b32.xlu1 %v1218_v15, %s1102_s17 }
 0x1be   :  { %v1255_v52 = vpop.f32.mrf.mxu1  ;;  %v1257_v53 = vpop.f32.mrf.mxu0 }
 0x1bf   :  { %v445_v59 = vsel %vm160_vm1, %v1255_v52, -inf  ;;  %v565_v61 = vsel %vm160_vm1, %v1257_v53, -inf }
 0x1c0   :  { %364 = vrot.lane.b32.xlu1 %v1218_v15, %s1117_s21 }
 0x1c2   :  { %343 = vrot.lane.b32.xlu0 %v1213_v10, %s1117_s21 }
 0x1c6   :  { %v440_v54 = vpop.f32.mrf.mxu1  ;;  %v540_v55 = vpop.f32.mrf.mxu0 }
 0x1c8   :  { %228 = vrot.lane.b32.xlu2 %v1213_v10, %s1102_s17  ;;  %s1118_s17 = smov 48  }
 0x1ce   :  { %v561_v56 = vpop.f32.mrf.mxu1 }
 0x1cf   :  { %v568_v58 = vsel %vm160_vm1, %v561_v56, -inf }
 0x1d6   :  { %v563_v57 = vpop.f32.mrf.mxu1 }
 0x1ea   :  { %569 = vmax.xlane.f32.xlu1 %v568_v58 }
 0x1ec   :  { %446 = vmax.xlane.f32.xlu0 %v445_v59 }
 0x1f1   :  { %443 = vmax.xlane.f32.xlu2 %v442_v60 }
 0x1f4   :  { %566 = vmax.xlane.f32.xlu0 %v565_v61 }
 0x212   :  { %v321_v62 = vpop.xlane.xlu1 %320 }
 0x213   :  { %v325_v63 = vsub.f32 %v292_v38, %v321_v62  ;;  %v206_v0 = vpop.xlane.xlu2 %205 }
 0x214   :  { %v210_v1 = vsub.f32 %v176_v39, %v206_v0 }
 0x215   :  { %v327_v4 = vmul.f32 1.442695, %v325_v63 }
 0x216   :  { %v212_v5 = vmul.f32 1.442695, %v210_v1 }
 0x217   :  { %913 = vpow2.f32 %v327_v4 }
 0x218   :  { %915 = vpow2.f32 %v212_v5 }
 0x21d   :  { %v1270_v6 = vpop.eup %913 }
 0x21e   :  { %v1272_v7 = vpop.eup %915  ;;  %v331_v8 = vsel %vm160_vm1, %v1270_v6, 0.0 }
 0x21f   :  { %v216_v9 = vsel %vm160_vm1, %v1272_v7, 0.0  ;;  %332 = vadd.xlane.f32.xlu0 %v331_v8 }
 0x220   :  { %217 = vadd.xlane.f32.xlu1 %v216_v9 }
 0x221   :  { %v209_v11 = vpop.xlane.xlu0 %208 }
 0x222   :  { %v211_v12 = vsub.f32 %v200_v44, %v209_v11 }
 0x223   :  { %v324_v13 = vpop.xlane.xlu2 %323 }
 0x224   :  { %v214_v14 = vmul.f32 1.442695, %v211_v12  ;;  %v326_v16 = vsub.f32 %v315_v46, %v324_v13 }
 0x226   :  { %917 = vpow2.f32 %v214_v14  ;;  %v329_v17 = vmul.f32 1.442695, %v326_v16 }
 0x228   :  { %919 = vpow2.f32 %v329_v17 }
 0x22a   :  { %v251_v18 = vpop.permute.xlu1 %250 }
 0x22b   :  { %v229_v19 = vpop.permute.xlu2 %228  ;;  %v256_v20 = vsel %vm233_vm2, %v251_v18, 0 }
 0x22c   :  { %v1279_v21 = vpop.eup %917  ;;  %v235_v22 = vsel %vm233_vm2, %v229_v19, 0 }
 0x22d   :  { %244 = vmatpush.bf16.msra.mxu3 %v235_v22  ;;  %v219_v23 = vsel %vm160_vm1, %v1279_v21, 0.0 }
 0x22e   :  { %v1284_v24 = vpop.eup %919  ;;  %220 = vadd.xlane.f32.xlu0 %v219_v23 }
 0x22f   :  { %v334_v25 = vsel %vm160_vm1, %v1284_v24, 0.0 }
 0x230   :  { %335 = vadd.xlane.f32.xlu2 %v334_v25 }
 0x231   :  { %265 = vmatpush.bf16.msrb.mxu3 %v256_v20 }
 0x232   :  { %v365_v28 = vpop.permute.xlu1 %364 }
 0x233   :  { %v370_v57 = vsel %vm233_vm2, %v365_v28, 0 }
 0x234   :  { %v344_v26 = vpop.permute.xlu0 %343 }
 0x235   :  { %v349_v27 = vsel %vm233_vm2, %v344_v26, 0 }
 0x236   :  { %358 = vmatpush.bf16.msrb.mxu2 %v349_v27 }
 0x239   :  { %487 = vrot.lane.b32.xlu1 %v1218_v15, %s1118_s17 }
 0x248   :  { %466 = vrot.lane.b32.xlu2 %v1213_v10, %s1118_s17 }
 0x25d   :  { %v570_v29 = vpop.xlane.xlu1 %569 }
 0x25e   :  { %v572_v30 = vsub.f32 %v561_v56, %v570_v29 }
 0x25f   :  { %v447_v31 = vpop.xlane.xlu0 %446 }
 0x260   :  { %v449_v32 = vsub.f32 %v1255_v52, %v447_v31  ;;  %v575_v34 = vmul.f32 1.442695, %v572_v30 }
 0x262   :  { %v452_v33 = vmul.f32 1.442695, %v449_v32 }
 0x264   :  { %921 = vpow2.f32 %v452_v33  ;;  %v444_v35 = vpop.xlane.xlu2 %443 }
 0x265   :  { %v448_v36 = vsub.f32 %v1250_v47, %v444_v35  ;;  %923 = vpow2.f32 %v575_v34 }
 0x267   :  { %v450_v37 = vmul.f32 1.442695, %v448_v36  ;;  %v567_v38 = vpop.xlane.xlu0 %566 }
 0x268   :  { %v571_v39 = vsub.f32 %v1257_v53, %v567_v38 }
 0x269   :  { %925 = vpow2.f32 %v450_v37 }
 0x26a   :  { %v922_v40 = vpop.eup %921  ;;  %v573_v41 = vmul.f32 1.442695, %v571_v39 }
 0x26b   :  { %v457_v42 = vsel %vm160_vm1, %v922_v40, 0.0  ;;  %v1295_v43 = vpop.eup %923 }
 0x26c   :  { %927 = vpow2.f32 %v573_v41  ;;  %458 = vadd.xlane.f32.xlu0 %v457_v42  ;;  %v580_v46 = vsel %vm160_vm1, %v1295_v43, 0.0 }
 0x26f   :  { %v926_v44 = vpop.eup %925 }
 0x270   :  { %v454_v45 = vsel %vm160_vm1, %v926_v44, 0.0 }
 0x271   :  { %455 = vadd.xlane.f32.xlu1 %v454_v45  ;;  %581 = vadd.xlane.f32.xlu2 %v580_v46  ;;  %v882_v46 = vld [vmem:[#allocation8 + $0x8] sm:$0xff] }
 0x272   :  { %v928_v47 = vpop.eup %927  ;;  %674 = vmatpush.bf16.msra.mxu0 %v882_v46 }
 0x273   :  { %v577_v48 = vsel %vm160_vm1, %v928_v47, 0.0 }
 0x274   :  { %578 = vadd.xlane.f32.xlu0 %v577_v48 }
 0x288   :  { %589 = vrot.lane.b32.xlu0 %v1213_v10, %s1119_s1 }
 0x28a   :  { %610 = vrot.lane.b32.xlu1 %v1218_v15, %s1119_s1 }
 0x292   :  { %v333_v49 = vpop.xlane.xlu0 %332 }
 0x293   :  { %v218_v50 = vpop.xlane.xlu1 %217  ;;  %929 = vrcp.f32 %v333_v49 }
 0x294   :  { %931 = vrcp.f32 %v218_v50 }
 0x299   :  { %v930_v51 = vpop.eup %929 }
 0x29a   :  { %v932_v52 = vpop.eup %931  ;;  %v339_v53 = vmul.f32 %v930_v51, %v1270_v6 }
 0x29b   :  { %v224_v54 = vmul.f32 %v932_v52, %v1272_v7 }
 0x29c   :  { %v341_v55 = vpack.c.bf16 %v339_v53, %v339_v53 }
 0x29d   :  { %v226_v56 = vpack.c.bf16 %v224_v54, %v224_v54 }
 0x29e   :  { %842 = vmatmul.msk.bf16.vlgmr.msrb.gmra.mxu2 %vm160_vm1, %v341_v55  ;;  %v910_v55 = vld [vmem:[%s1353_s4] ss:$0 sm:$0xff] }
 0x29f   :  { %838 = vmatmul.msk.bf16.vlgmr.msra.gmra.mxu3 %vm160_vm1, %v226_v56 }
 0x2a0   :  { %379 = vmatpush.bf16.msra.mxu3 %v370_v57 }
 0x2a1   :  { %v221_v10 = vpop.xlane.xlu0 %220 }
 0x2a2   :  { %933 = vrcp.f32 %v221_v10 }
 0x2a3   :  { %v336_v15 = vpop.xlane.xlu2 %335 }
 0x2a4   :  { %935 = vrcp.f32 %v336_v15 }
 0x2a8   :  { %v934_v58 = vpop.eup %933 }
 0x2a9   :  { %v225_v59 = vmul.f32 %v934_v58, %v1279_v21 }
 0x2aa   :  { %v936_v1 = vpop.eup %935 }
 0x2ab   :  { %v467_v60 = vpop.permute.xlu2 %466  ;;  %v488_v62 = vpop.permute.xlu1 %487  ;;  %v227_v63 = vpack.c.bf16 %v225_v59, %v225_v59  ;;  %v340_v4 = vmul.f32 %v936_v1, %v1284_v24  ;;  %v884_v1 = vld [vmem:[#allocation9 + $0x8] sm:$0xff] }
 0x2ac   :  { %v472_v61 = vsel %vm233_vm2, %v467_v60, 0  ;;  %v493_v0 = vsel %vm233_vm2, %v488_v62, 0  ;;  %754 = vmatpush.bf16.msra.mxu1 %v884_v1 }
 0x2ad   :  { %481 = vmatpush.bf16.msra.mxu2 %v472_v61  ;;  %v342_v5 = vpack.c.bf16 %v340_v4, %v340_v4 }
 0x2af   :  { %839 = vmatmul.msk.bf16.vlgmr.msrb.gmra.mxu3 %vm160_vm1, %v227_v63 }
 0x2b0   :  { %502 = vmatpush.bf16.msrb.mxu3 %v493_v0 }
 0x2bf   :  { %843 = vmatmul.msk.bf16.vlgmr.msra.gmra.mxu3 %vm160_vm1, %v342_v5 }
 0x2df   :  { %v459_v6 = vpop.xlane.xlu0 %458 }
 0x2e0   :  { %937 = vrcp.f32 %v459_v6 }
 0x2e4   :  { %v456_v7 = vpop.xlane.xlu1 %455  ;;  %v582_v14 = vpop.xlane.xlu2 %581 }
 0x2e5   :  { %939 = vrcp.f32 %v456_v7 }
 0x2e6   :  { %v938_v8 = vpop.eup %937  ;;  %941 = vrcp.f32 %v582_v14 }
 0x2e7   :  { %v463_v9 = vmul.f32 %v938_v8, %v922_v40  ;;  %v579_v17 = vpop.xlane.xlu0 %578 }
 0x2e8   :  { %943 = vrcp.f32 %v579_v17 }
 0x2e9   :  { %v465_v11 = vpack.c.bf16 %v463_v9, %v463_v9  ;;  %v883_v9 = vld [vmem:[#allocation9] sm:$0xff] }
 0x2ea   :  { %755 = vmatpush.bf16.msra.mxu1 %v883_v9 }
 0x2eb   :  { %847 = vmatmul.msk.bf16.vlgmr.msrb.gmra.mxu3 %vm160_vm1, %v465_v11  ;;  %v940_v12 = vpop.eup %939 }
 0x2ec   :  { %v462_v13 = vmul.f32 %v940_v12, %v926_v44  ;;  %v942_v18 = vpop.eup %941 }
 0x2ed   :  { %v586_v21 = vmul.f32 %v942_v18, %v1295_v43 }
 0x2ee   :  { %v464_v16 = vpack.c.bf16 %v462_v13, %v462_v13  ;;  %v944_v19 = vpop.eup %943 }
 0x2ef   :  { %v585_v22 = vmul.f32 %v944_v19, %v928_v47  ;;  %v588_v26 = vpack.c.bf16 %v586_v21, %v586_v21  ;;  %v881_v47 = vld [vmem:[#allocation8] sm:$0xff] }
 0x2f0   :  { %846 = vmatmul.msk.bf16.vlgmr.msra.gmra.mxu2 %vm160_vm1, %v464_v16  ;;  %675 = vmatpush.bf16.msra.mxu0 %v881_v47 }
 0x2f1   :  { %v587_v27 = vpack.c.bf16 %v585_v22, %v585_v22 }
 0x2fa   :  { %v590_v20 = vpop.permute.xlu0 %589 }
 0x2fb   :  { %v595_v23 = vsel %vm233_vm2, %v590_v20, 0 }
 0x2fc   :  { %v611_v24 = vpop.permute.xlu1 %610  ;;  %604 = vmatpush.bf16.msrb.mxu2 %v595_v23 }
 0x2fd   :  { %v616_v25 = vsel %vm233_vm2, %v611_v24, 0 }
 0x2fe   :  { %625 = vmatpush.bf16.msra.mxu3 %v616_v25 }
 0x300   :  { %850 = vmatmul.msk.bf16.vlgmr.msrb.gmra.mxu2 %vm160_vm1, %v587_v27 }
 0x301   :  { %851 = vmatmul.msk.bf16.vlgmr.msra.gmra.mxu3 %vm160_vm1, %v588_v26 }
 0x321   :  { %v360_v28 = vpop.f32.mrf.mxu2 }
 0x322   :  { %v246_v29 = vpop.f32.mrf.mxu3  ;;  %387 = vrot.lane.b32.xlu0 %v360_v28, %s1107_s28 }
 0x323   :  { %271 = vst.msk [vmem:[#allocation2] sm:$0xff] %vm160_vm1, %v246_v29 }
 0x329   :  { %v362_v30 = vpop.f32.mrf.mxu2 }
 0x32a   :  { %v248_v31 = vpop.f32.mrf.mxu3 }
 0x332   :  { %v267_v32 = vpop.f32.mrf.mxu3 }
 0x333   :  { %272 = vst.msk [vmem:[#allocation2 + $0x8] sm:$0xff] %vm160_vm1, %v267_v32 }
 0x33a   :  { %v269_v33 = vpop.f32.mrf.mxu3 }
 0x342   :  { %v381_v34 = vpop.f32.mrf.mxu3 }
 0x343   :  { %389 = vrot.lane.b32.xlu1 %v381_v34, %s1107_s28 }
 0x34a   :  { %v383_v35 = vpop.f32.mrf.mxu3 }
 0x34b   :  { %v886_v35 = vld [vmem:[#allocation11 + $0x8] sm:$0xff] }
 0x34c   :  { %794 = vmatpush.bf16.msra.mxu2 %v886_v35 }
 0x36e   :  { %v504_v36 = vpop.f32.mrf.mxu3 }
 0x36f   :  { %512 = vrot.lane.b32.xlu1 %v504_v36, %s1120_s22  ;;  %v885_v36 = vld [vmem:[#allocation11] sm:$0xff] }
 0x370   :  { %795 = vmatpush.bf16.msra.mxu2 %v885_v36 }
 0x373   :  { %v483_v37 = vpop.f32.mrf.mxu2 }
 0x374   :  { %510 = vrot.lane.b32.xlu0 %v483_v37, %s1120_s22 }
 0x376   :  { %v506_v38 = vpop.f32.mrf.mxu3 }
 0x377   :  { %v911_v38 = vld [vmem:[%s1355_s6] ss:$0 sm:$0xff]  ;;  %s810_s6 = sshll.u32 %s1122_s29, 4  ;;  %s811_s6 = int_to_ptr.vmem [resolvable:$true] %s810_s6 }
 0x37b   :  { %v485_v39 = vpop.f32.mrf.mxu2 }
 0x383   :  { %v606_v40 = vpop.f32.mrf.mxu2 }
 0x384   :  { %v627_v41 = vpop.f32.mrf.mxu3  ;;  %633 = vrot.lane.b32.xlu2 %v606_v40, %s1121_s5 }
 0x385   :  { %635 = vrot.lane.b32.xlu0 %v627_v41, %s1121_s5 }
 0x38b   :  { %v608_v42 = vpop.f32.mrf.mxu2 }
 0x38c   :  { %v629_v43 = vpop.f32.mrf.mxu3 }
 0x394   :  { %v388_v44 = vpop.permute.xlu0 %387 }
 0x395   :  { %394 = vst.msk [vmem:[#allocation2] sm:$0xff] %vm393_vm3, %v388_v44 }
 0x3b5   :  { %v390_v45 = vpop.permute.xlu1 %389 }
 0x3b6   :  { %395 = vst.msk [vmem:[#allocation2 + $0x8] sm:$0xff] %vm393_vm3, %v390_v45  ;;  %v912_v45 = vld [vmem:[%s1357_s8] ss:$0 sm:$0xff] }
 0x3de   :  { %v634_v50 = vpop.permute.xlu2 %633 }
 0x3e1   :  { %v513_v48 = vpop.permute.xlu1 %512 }
 0x3e2   :  { %518 = vst.msk [vmem:[#allocation2 + $0x8] sm:$0xff] %vm516_vm4, %v513_v48 }
 0x3e6   :  { %v511_v49 = vpop.permute.xlu0 %510 }
 0x3e7   :  { %517 = vst.msk [vmem:[#allocation2] sm:$0xff] %vm516_vm4, %v511_v49 }
 0x3e8   :  { %640 = vst.msk [vmem:[#allocation2] sm:$0xff] %vm639_vm5, %v634_v50 }
 0x3ef   :  { %v642_v52 = vld [vmem:[#allocation2] sm:$0xff] }
 0x3f7   :  { %v636_v51 = vpop.permute.xlu0 %635 }
 0x3f8   :  { %641 = vst.msk [vmem:[#allocation2 + $0x8] sm:$0xff] %vm639_vm5, %v636_v51 }
 0x3ff   :  { %v643_v53 = vld [vmem:[#allocation2 + $0x8] sm:$0xff] }
 0x400   :  { %v644_v54 = vpack.c.bf16 %v643_v53, %v642_v52 }
 0x402   :  { %860 = vmatmul.msk.bf16.vlgmr.msra.gmra.mxu0 %vm135_vm0, %v644_v54 }
 0x47f   :  { %v677_v56 = vpop.f32.mrf.mxu0 }
 0x480   :  { %v678_v57 = vadd.f32 %v910_v55, %v677_v56 }
 0x482   :  { %v682_v10 = vadd.f32 %v678_v57, %v1203_v2 }
 0x484   :  { %v684_v15 = vmul.f32 %v682_v10, %v682_v10 }
 0x486   :  { %v686_v58 = vsel %vm135_vm0, %v684_v15, 0.0 }
 0x487   :  { %v687_v59 = vrot.slane %v686_v58, 4  ;;  %v679_v60 = vpop.f32.mrf.mxu0 }
 0x488   :  { %v680_v61 = vadd.f32 %v910_v55, %v679_v60 }
 0x489   :  { %v688_v62 = vadd.f32 %v687_v59, %v686_v58 }
 0x48a   :  { %v683_v63 = vadd.f32 %v680_v61, %v1205_v3 }
 0x48b   :  { %v689_v0 = vrot.slane %v688_v62, 2 }
 0x48c   :  { %v685_v4 = vmul.f32 %v683_v63, %v683_v63 }
 0x48d   :  { %v690_v5 = vadd.f32 %v689_v0, %v688_v62 }
 0x48e   :  { %v693_v6 = vsel %vm135_vm0, %v685_v4, 0.0 }
 0x48f   :  { %v691_v7 = vrot.slane %v690_v5, 1  ;;  %v694_v8 = vrot.slane %v693_v6, 4 }
 0x491   :  { %v692_v2 = vadd.f32 %v691_v7, %v690_v5  ;;  %v695_v11 = vadd.f32 %v694_v8, %v693_v6 }
 0x493   :  { %v700_v12 = vmax.f32 %v692_v2, 1e-24  ;;  %v696_v13 = vrot.slane %v695_v11, 2 }
 0x495   :  { %945 = vrsqrt.f32 %v700_v12  ;;  %v697_v14 = vadd.f32 %v696_v13, %v695_v11  ;;  %vm708_vm7 = vweird.f32 %v700_v12 }
 0x497   :  { %v698_v16 = vrot.slane %v697_v14, 1 }
 0x499   :  { %v699_v17 = vadd.f32 %v698_v16, %v697_v14 }
 0x49b   :  { %v946_v3 = vpop.eup %945  ;;  %v701_v18 = vmax.f32 %v699_v17, 1e-24 }
 0x49c   :  { %v703_v19 = vmul.f32 %v946_v3, %v700_v12  ;;  %vm709_vm6 = vweird.f32 %v946_v3 }
 0x49d   :  { %947 = vrsqrt.f32 %v701_v18  ;;  %vm710_vm9 = vmor %vm708_vm7, %vm709_vm6  ;;  %vm718_vm10 = vweird.f32 %v701_v18 }
 0x49e   :  { %v704_v20 = vmul.f32 %v946_v3, %v703_v19 }
 0x4a0   :  { %v705_v21 = vmul.f32 0.5, %v704_v20 }
 0x4a2   :  { %v706_v23 = vsub.f32 1.5, %v705_v21 }
 0x4a3   :  { %v948_v22 = vpop.eup %947 }
 0x4a4   :  { %v713_v24 = vmul.f32 %v948_v22, %v701_v18  ;;  %v707_v26 = vmul.f32 %v946_v3, %v706_v23  ;;  %vm719_vm8 = vweird.f32 %v948_v22 }
 0x4a5   :  { %vm720_vm11 = vmor %vm718_vm10, %vm719_vm8 }
 0x4a6   :  { %v714_v25 = vmul.f32 %v948_v22, %v713_v24  ;;  %v711_v29 = vsel %vm710_vm9, %v946_v3, %v707_v26 }
 0x4a7   :  { %v722_v32 = vmul.f32 %v711_v29, %v682_v10 }
 0x4a8   :  { %v715_v27 = vmul.f32 0.5, %v714_v25 }
 0x4aa   :  { %v716_v28 = vsub.f32 1.5, %v715_v27 }
 0x4ac   :  { %v717_v30 = vmul.f32 %v948_v22, %v716_v28 }
 0x4ae   :  { %v721_v31 = vsel %vm720_vm11, %v948_v22, %v717_v30 }
 0x4af   :  { %v723_v33 = vmul.f32 %v721_v31, %v683_v63 }
 0x4b1   :  { %v724_v34 = vpack.c.bf16 %v723_v33, %v722_v32 }
 0x4b3   :  { %869 = vmatmul.msk.bf16.vlgmr.msra.gmra.mxu1 %vm135_vm0, %v724_v34 }
 0x530   :  { %v757_v37 = vpop.f32.mrf.mxu1 }
 0x531   :  { %v758_v39 = vadd.f32 %v911_v38, %v757_v37 }
 0x533   :  { %v762_v42 = vmax.f32 %v758_v39, 0.0 }
 0x538   :  { %v759_v40 = vpop.f32.mrf.mxu1 }
 0x539   :  { %v760_v41 = vadd.f32 %v911_v38, %v759_v40 }
 0x53b   :  { %v763_v43 = vmax.f32 %v760_v41, 0.0 }
 0x53d   :  { %v764_v44 = vpack.c.bf16 %v763_v43, %v762_v42 }
 0x53f   :  { %878 = vmatmul.msk.bf16.vlgmr.msra.gmra.mxu2 %vm135_vm0, %v764_v44 }
 0x5c2   :  { %v797_v46 = vpop.f32.mrf.mxu2 }
 0x5c3   :  { %v798_v47 = vadd.f32 %v912_v45, %v797_v46 }
 0x5c5   :  { %v802_v48 = vadd.f32 %v798_v47, %v722_v32 }
 0x5c7   :  { %804 = vst.msk [vmem:[#allocation12] sm:$0xff] %vm135_vm0, %v802_v48 }
 0x5ca   :  { %v799_v49 = vpop.f32.mrf.mxu2 }
 0x5cb   :  { %v800_v50 = vadd.f32 %v912_v45, %v799_v49 }
 0x5cd   :  { %v803_v51 = vadd.f32 %v800_v50, %v723_v33 }
 0x5cf   :  { %805 = vst.msk [vmem:[#allocation12 + $0x8] sm:$0xff] %vm135_vm0, %v803_v51 }
 0x5d0   :  { %818 = dma.vmem_to_hbm [thread:$0]  %s811_s6, 256, %s813_s11, [#allocation5], %s1106_s27, %s1106_s27, %s1107_s28  }
 0x5d1   :  { %1099 = dma.done.wait [#allocation5], 256  }
 0x5d2   :  { %1100 = vsyncadd [#allocation5], 4294967040 }
 0x5d3   :  { %823 = vsyncpa [#allocation4], 1 }
 0x5d4   :  { %824 = vsyncpa [#allocation7], 1 }
 0x5d5   :  { %825 = vsyncpa [#allocation10], 1 }
 0x5d6   :  { %826 = vsyncpa [#allocation5], 1 }

</bundles_post_ra>
